<compile_context>
chip_gen: v6e
topology: v6e:2x2x1
jax: 0.10.0
libtpu: 0.0.40
codegen_flags: <defaults>
</compile_context>

<pallas_src>
import numpy as np

import jax
import jax.numpy as jnp
from jax.experimental import pallas as pl
from jax.experimental.pallas import tpu as pltpu


# ----------------------------- Pallas kernel --------------------------------

def _make_fused_cnn_kernel(num_layers, h_outs, compute_dtype):
    """Builds the fused kernel for a fixed layer geometry (one image per grid step).

    Kernel refs (channels-last 2D slabs, lanes = W*C):
      x_ref : (H0+2, W0*C0)         row-padded input slab (zero rows = conv row padding)
      m_l   : (3, Wl*Cl, Wl'*Cl')   per-dy weight-scatter matrices, dx pre-summed
      b_l   : (1, Wl'*Cl')          bias tiled along W'
      wfc   : (WL*CL, K)            FC weight tiled along W, pre-scaled by 1/(HL*WL)
      bfc   : (1, K)
      o_ref : (1, K)
      pad_l : (Hl'+2, Wl'*Cl')      scratch: row-padded activation of layer l (l < L-1)
    """
    def kernel(*refs):
        o_ref = refs[3 + 2 * num_layers]
        pads = refs[4 + 2 * num_layers:]
        src = refs[0]
        y = None
        for l in range(num_layers):
            m_ref = refs[1 + 2 * l]
            b_ref = refs[2 + 2 * l]
            h_out = h_outs[l]
            acc = None
            for dy in range(3):
                # stride-2 row gather (+ zero padding) via a strided sublane read; the
                # column gather / padding / channel contraction are folded into m_ref[dy].
                a = src[pl.ds(dy, h_out, stride=2), :].astype(compute_dtype)
                c = jnp.dot(a, m_ref[dy], preferred_element_type=jnp.float32)
                acc = c if acc is None else acc + c          # f32 accumulation
            y = jnp.maximum(acc + b_ref[...], 0.0)           # bias + ReLU (f32 epilogue)
            # TODO(synk): Dropout2d(p=0.5) is identity in eval/inference mode;
            # training-mode channel dropout is not implemented here.
            if l + 1 < num_layers:
                pad = pads[l]
                pad[...] = jnp.zeros_like(pad)               # zero pad rows (tiny buffer)
                pad[pl.ds(1, h_out), :] = y                  # activation at rows 1..H
                src = pad
        wfc_ref = refs[1 + 2 * num_layers]
        bfc_ref = refs[2 + 2 * num_layers]
        # global average pool (1/(H*W) folded into wfc) + Linear
        pooled = jnp.sum(y, axis=0, keepdims=True)           # (1, WL*CL)
        logits = jnp.dot(pooled, wfc_ref[...], preferred_element_type=jnp.float32)
        o_ref[...] = (logits + bfc_ref[...]).astype(o_ref.dtype)

    return kernel


# --------------------- structural (shape-only) helpers ------------------------

def _col_select(w_in, w_out, dx):
    """S[w, j] = 1 iff w == 2j+dx-1 (zero columns implement width padding)."""
    s = np.zeros((w_in, w_out), np.float32)
    for j in range(w_out):
        w = 2 * j + dx - 1
        if 0 <= w < w_in:
            s[w, j] = 1.0
    return s


# ------------------------------ model wrapper --------------------------------

def make_cnn_forward(params, input_hw, batch, compute_dtype=jnp.bfloat16):
    """Precompute weight-derived matrices ONCE and return a jittable forward(x)."""
    h, w = input_hw
    c_in = params["convs"][0][0].shape[2]
    num_classes = params["fc_w"].shape[1]
    num_layers = len(params["convs"])

    weight_args = []
    h_outs = []
    scratch_shapes = []
    h_in, w_in, c = h, w, c_in
    for l, (w4, b) in enumerate(params["convs"]):            # w4: (3,3,Cin,Cout), b: (1,Cout)
        c_out = w4.shape[-1]
        h_out = (h_in - 1) // 2 + 1
        w_out = (w_in - 1) // 2 + 1
        # Per-dy weight-scatter matrices with dx PRE-SUMMED (one matmul per dy):
        #   M_dy[w*Cin+ci, j*Cout+co] = sum_dx W[dy,dx,ci,co] * [w == 2j+dx-1]
        m = jnp.zeros((3, w_in * c, w_out * c_out), jnp.float32)
        for dy in range(3):
            md = jnp.zeros((w_in, c, w_out, c_out), jnp.float32)
            for dx in range(3):
                s = jnp.asarray(_col_select(w_in, w_out, dx))            # (Win, Wo)
                md = md + jnp.einsum("wj,cd->wcjd", s, w4[dy, dx])
            m = m.at[dy].set(md.reshape(w_in * c, w_out * c_out))
        weight_args += [m.astype(compute_dtype),                          # bf16 MXU operand
                        jnp.tile(b, (1, w_out)).astype(jnp.float32)]      # f32 epilogue
        h_outs.append(h_out)
        if l + 1 < num_layers:
            # row-padded scratch slab for the next layer's strided row gather
            scratch_shapes.append(pltpu.VMEM((h_out + 2, w_out * c_out), jnp.float32))
        h_in, w_in, c = h_out, w_out, c_out

    # head: pooling folded into the FC weight (tiled along W, scaled by 1/(H*W))
    wfc_big = (jnp.tile(params["fc_w"], (w_in, 1)) / float(h_in * w_in)).astype(jnp.float32)
    weight_args += [wfc_big, params["fc_b"].astype(jnp.float32)]

    kernel = _make_fused_cnn_kernel(num_layers, tuple(h_outs), compute_dtype)

    in_specs = [pl.BlockSpec((None, h + 2, w * c_in), lambda n: (n, 0, 0))]
    for a in weight_args:                                     # full-array, grid-invariant
        in_specs.append(pl.BlockSpec(a.shape, lambda n, _nd=a.ndim: (0,) * _nd))
    out_specs = pl.BlockSpec((None, 1, num_classes), lambda n: (n, 0, 0))

    call = pl.pallas_call(
        kernel,
        out_shape=jax.ShapeDtypeStruct((batch, 1, num_classes), jnp.float32),
        grid=(batch,),
        in_specs=in_specs,
        out_specs=out_specs,
        scratch_shapes=scratch_shapes,
        compiler_params=pltpu.CompilerParams(dimension_semantics=("parallel",)),
    )

    def forward(x_nchw):
        n, ci, hh, ww = x_nchw.shape
        # NCHW -> per-image channel-last slab (N, H, W*C), then add zero rows top/bottom
        # per image (conv row padding; the extra bottom row also keeps strided reads in
        # bounds).  Width padding lives inside the M_dy matrices.
        x3 = jnp.transpose(x_nchw, (0, 2, 3, 1)).reshape(n, hh, ww * ci)
        x_pad = jnp.pad(x3, ((0, 0), (1, 1), (0, 0)))
        out = call(x_pad, *weight_args)
        return out.reshape(n, num_classes)

    return forward


# ------------------------------ params / reference ---------------------------

def init_params(key, in_channels=1, num_filters=16, num_layers=3, num_classes=10):
    """Glorot (xavier) uniform init, zero biases — matches initialize_weights."""
    params = {"convs": []}
    for i in range(num_layers):
        cin = in_channels if i == 0 else num_filters
        key, sub = jax.random.split(key)
        fan_in, fan_out = cin * 9, num_filters * 9
        bound = (6.0 / (fan_in + fan_out)) ** 0.5
        w4 = jax.random.uniform(sub, (3, 3, cin, num_filters), jnp.float32, -bound, bound)
        b = jnp.zeros((1, num_filters), jnp.float32)
        params["convs"].append((w4, b))
    key, sub = jax.random.split(key)
    bound = (6.0 / (num_filters + num_classes)) ** 0.5
    params["fc_w"] = jax.random.uniform(sub, (num_filters, num_classes), jnp.float32, -bound, bound)
    params["fc_b"] = jnp.zeros((1, num_classes), jnp.float32)
    return params


def cnn_forward_reference(x_nchw, params):
    x = x_nchw
    for (w4, b) in params["convs"]:
        y = jax.lax.conv_general_dilated(
            x, w4, window_strides=(2, 2), padding=((1, 1), (1, 1)),
            dimension_numbers=("NCHW", "HWIO", "NCHW"))
        x = jnp.maximum(y + b.reshape(1, -1, 1, 1), 0.0)
    pooled = jnp.mean(x, axis=(2, 3))                         # AdaptiveAvgPool2d((1,1))
    return pooled @ params["fc_w"] + params["fc_b"]


# ------------------------------ main ------------------------------------------

if __name__ == "__main__":
    key = jax.random.PRNGKey(0)
    k_x, k_p = jax.random.split(key)

    # Small shapes consistent with the module: input_shape=(1, 16, 16), batch=2,
    # num_filters=16, num_layers=3, num_classes=10.  Spatial: 16 -> 8 -> 4 -> 2.
    N, C_in, H, W = 2, 1, 16, 16
    x = jax.random.normal(k_x, (N, C_in, H, W), jnp.float32)
    params = init_params(k_p, in_channels=C_in, num_filters=16, num_layers=3, num_classes=10)

    fwd = jax.jit(make_cnn_forward(params, (H, W), N))
    out = jax.block_until_ready(fwd(x))

    ref = cnn_forward_reference(x, params)
    assert out.shape == (N, 10), out.shape
    # Tolerance covers bf16 MXU-operand rounding (per perf review: bf16 feed with f32
    # accumulation) vs the f32 XLA reference; structural bugs would be orders larger.
    assert jnp.allclose(out, ref, rtol=2e-2, atol=5e-3), (out, ref)

    print("KERNEL_OK")
</pallas_src>

<mosaic_0001>
module attributes {stable_mosaic.version = 11 : i64} {
  func.func @kernel(%arg0: i32, %arg1: memref<1x18x16xf32, #tpu.memory_space<vmem>>, %arg2: memref<3x16x128xbf16, #tpu.memory_space<vmem>>, %arg3: memref<1x128xf32, #tpu.memory_space<vmem>>, %arg4: memref<3x128x64xbf16, #tpu.memory_space<vmem>>, %arg5: memref<1x64xf32, #tpu.memory_space<vmem>>, %arg6: memref<3x64x32xbf16, #tpu.memory_space<vmem>>, %arg7: memref<1x32xf32, #tpu.memory_space<vmem>>, %arg8: memref<32x10xf32, #tpu.memory_space<vmem>>, %arg9: memref<1x10xf32, #tpu.memory_space<vmem>>, %arg10: memref<1x1x10xf32, #tpu.memory_space<vmem>>, %arg11: memref<10x128xf32, #tpu.memory_space<vmem>>, %arg12: memref<6x64xf32, #tpu.memory_space<vmem>>) attributes {dimension_semantics = [#tpu.dimension_semantics<parallel>], iteration_bounds = array<i64: 2>, scalar_prefetch = 0 : i64, scratch_operands = 2 : i64, tpu.core_type = #tpu.core_type<tc>, window_params = [{transform_indices = @transform_0, window_bounds = array<i64: 1, 18, 16>}, {pipeline_mode = #tpu.pipeline_mode<synchronous>, transform_indices = @transform_1, window_bounds = array<i64: 3, 16, 128>}, {pipeline_mode = #tpu.pipeline_mode<synchronous>, transform_indices = @transform_2, window_bounds = array<i64: 1, 128>}, {pipeline_mode = #tpu.pipeline_mode<synchronous>, transform_indices = @transform_3, window_bounds = array<i64: 3, 128, 64>}, {pipeline_mode = #tpu.pipeline_mode<synchronous>, transform_indices = @transform_4, window_bounds = array<i64: 1, 64>}, {pipeline_mode = #tpu.pipeline_mode<synchronous>, transform_indices = @transform_5, window_bounds = array<i64: 3, 64, 32>}, {pipeline_mode = #tpu.pipeline_mode<synchronous>, transform_indices = @transform_6, window_bounds = array<i64: 1, 32>}, {pipeline_mode = #tpu.pipeline_mode<synchronous>, transform_indices = @transform_7, window_bounds = array<i64: 32, 10>}, {pipeline_mode = #tpu.pipeline_mode<synchronous>, transform_indices = @transform_8, window_bounds = array<i64: 1, 10>}, {transform_indices = @transform_9, window_bounds = array<i64: 1, 1, 10>}]} {
    %c0 = arith.constant 0 : index
    %c0_0 = arith.constant 0 : index
    %c0_1 = arith.constant 0 : index
    %0 = tpu.strided_load %arg1[%c0, %c0_0, %c0_1] {strides = array<i32: 1, 2, 1>} : memref<1x18x16xf32, #tpu.memory_space<vmem>>, vector<1x8x16xf32>
    %1 = vector.shape_cast %0 : vector<1x8x16xf32> to vector<8x16xf32>
    %2 = arith.truncf %1 : vector<8x16xf32> to vector<8x16xbf16>
    %c0_2 = arith.constant 0 : index
    %c0_3 = arith.constant 0 : index
    %c0_4 = arith.constant 0 : index
    %3 = vector.load %arg2[%c0_2, %c0_3, %c0_4] : memref<3x16x128xbf16, #tpu.memory_space<vmem>>, vector<1x16x128xbf16>
    %4 = vector.shape_cast %3 : vector<1x16x128xbf16> to vector<16x128xbf16>
    %cst = arith.constant dense<0.000000e+00> : vector<8x128xf32>
    %5 = tpu.matmul %2, %4, %cst {dimension_numbers = #tpu.dot_dimension_numbers<[1], [0], [0], [1], [0, 0, 1, 1], [], []>} : vector<8x16xbf16>, vector<16x128xbf16>, vector<8x128xf32> -> vector<8x128xf32>
    %c0_5 = arith.constant 0 : index
    %c1 = arith.constant 1 : index
    %c0_6 = arith.constant 0 : index
    %6 = tpu.strided_load %arg1[%c0_5, %c1, %c0_6] {strides = array<i32: 1, 2, 1>} : memref<1x18x16xf32, #tpu.memory_space<vmem>>, vector<1x8x16xf32>
    %7 = vector.shape_cast %6 : vector<1x8x16xf32> to vector<8x16xf32>
    %8 = arith.truncf %7 : vector<8x16xf32> to vector<8x16xbf16>
    %c1_7 = arith.constant 1 : index
    %c0_8 = arith.constant 0 : index
    %c0_9 = arith.constant 0 : index
    %9 = vector.load %arg2[%c1_7, %c0_8, %c0_9] : memref<3x16x128xbf16, #tpu.memory_space<vmem>>, vector<1x16x128xbf16>
    %10 = vector.shape_cast %9 : vector<1x16x128xbf16> to vector<16x128xbf16>
    %cst_10 = arith.constant dense<0.000000e+00> : vector<8x128xf32>
    %11 = tpu.matmul %8, %10, %cst_10 {dimension_numbers = #tpu.dot_dimension_numbers<[1], [0], [0], [1], [0, 0, 1, 1], [], []>} : vector<8x16xbf16>, vector<16x128xbf16>, vector<8x128xf32> -> vector<8x128xf32>
    %12 = arith.addf %5, %11 : vector<8x128xf32>
    %c0_11 = arith.constant 0 : index
    %c2 = arith.constant 2 : index
    %c0_12 = arith.constant 0 : index
    %13 = tpu.strided_load %arg1[%c0_11, %c2, %c0_12] {strides = array<i32: 1, 2, 1>} : memref<1x18x16xf32, #tpu.memory_space<vmem>>, vector<1x8x16xf32>
    %14 = vector.shape_cast %13 : vector<1x8x16xf32> to vector<8x16xf32>
    %15 = arith.truncf %14 : vector<8x16xf32> to vector<8x16xbf16>
    %c2_13 = arith.constant 2 : index
    %c0_14 = arith.constant 0 : index
    %c0_15 = arith.constant 0 : index
    %16 = vector.load %arg2[%c2_13, %c0_14, %c0_15] : memref<3x16x128xbf16, #tpu.memory_space<vmem>>, vector<1x16x128xbf16>
    %17 = vector.shape_cast %16 : vector<1x16x128xbf16> to vector<16x128xbf16>
    %cst_16 = arith.constant dense<0.000000e+00> : vector<8x128xf32>
    %18 = tpu.matmul %15, %17, %cst_16 {dimension_numbers = #tpu.dot_dimension_numbers<[1], [0], [0], [1], [0, 0, 1, 1], [], []>} : vector<8x16xbf16>, vector<16x128xbf16>, vector<8x128xf32> -> vector<8x128xf32>
    %19 = arith.addf %12, %18 : vector<8x128xf32>
    %c0_17 = arith.constant 0 : index
    %c0_18 = arith.constant 0 : index
    %20 = vector.load %arg3[%c0_17, %c0_18] : memref<1x128xf32, #tpu.memory_space<vmem>>, vector<1x128xf32>
    %21 = vector.broadcast %20 : vector<1x128xf32> to vector<8x128xf32>
    %22 = arith.addf %19, %21 : vector<8x128xf32>
    %cst_19 = arith.constant 0.000000e+00 : f32
    %23 = vector.broadcast %cst_19 : f32 to vector<8x128xf32>
    %24 = arith.maximumf %22, %23 : vector<8x128xf32>
    %cst_20 = arith.constant 0.000000e+00 : f32
    %25 = vector.broadcast %cst_20 : f32 to vector<10x128xf32>
    %c0_21 = arith.constant 0 : index
    %c0_22 = arith.constant 0 : index
    %26 = vector.load %arg11[%c0_21, %c0_22] : memref<10x128xf32, #tpu.memory_space<vmem>>, vector<10x128xf32>
    tpu.vector_store %arg11[%c0_21, %c0_22], %25 {strides = array<i32>} : memref<10x128xf32, #tpu.memory_space<vmem>>, vector<10x128xf32>,
    %c1_23 = arith.constant 1 : index
    %c0_24 = arith.constant 0 : index
    %27 = vector.load %arg11[%c1_23, %c0_24] : memref<10x128xf32, #tpu.memory_space<vmem>>, vector<8x128xf32>
    tpu.vector_store %arg11[%c1_23, %c0_24], %24 {strides = array<i32>} : memref<10x128xf32, #tpu.memory_space<vmem>>, vector<8x128xf32>,
    %c0_25 = arith.constant 0 : index
    %c0_26 = arith.constant 0 : index
    %28 = tpu.strided_load %arg11[%c0_25, %c0_26] {strides = array<i32: 2, 1>} : memref<10x128xf32, #tpu.memory_space<vmem>>, vector<4x128xf32>
    %29 = arith.truncf %28 : vector<4x128xf32> to vector<4x128xbf16>
    %c0_27 = arith.constant 0 : index
    %c0_28 = arith.constant 0 : index
    %c0_29 = arith.constant 0 : index
    %30 = vector.load %arg4[%c0_27, %c0_28, %c0_29] : memref<3x128x64xbf16, #tpu.memory_space<vmem>>, vector<1x128x64xbf16>
    %31 = vector.shape_cast %30 : vector<1x128x64xbf16> to vector<128x64xbf16>
    %cst_30 = arith.constant dense<0.000000e+00> : vector<4x64xf32>
    %32 = tpu.matmul %29, %31, %cst_30 {dimension_numbers = #tpu.dot_dimension_numbers<[1], [0], [0], [1], [0, 0, 1, 1], [], []>} : vector<4x128xbf16>, vector<128x64xbf16>, vector<4x64xf32> -> vector<4x64xf32>
    %c1_31 = arith.constant 1 : index
    %c0_32 = arith.constant 0 : index
    %33 = tpu.strided_load %arg11[%c1_31, %c0_32] {strides = array<i32: 2, 1>} : memref<10x128xf32, #tpu.memory_space<vmem>>, vector<4x128xf32>
    %34 = arith.truncf %33 : vector<4x128xf32> to vector<4x128xbf16>
    %c1_33 = arith.constant 1 : index
    %c0_34 = arith.constant 0 : index
    %c0_35 = arith.constant 0 : index
    %35 = vector.load %arg4[%c1_33, %c0_34, %c0_35] : memref<3x128x64xbf16, #tpu.memory_space<vmem>>, vector<1x128x64xbf16>
    %36 = vector.shape_cast %35 : vector<1x128x64xbf16> to vector<128x64xbf16>
    %cst_36 = arith.constant dense<0.000000e+00> : vector<4x64xf32>
    %37 = tpu.matmul %34, %36, %cst_36 {dimension_numbers = #tpu.dot_dimension_numbers<[1], [0], [0], [1], [0, 0, 1, 1], [], []>} : vector<4x128xbf16>, vector<128x64xbf16>, vector<4x64xf32> -> vector<4x64xf32>
    %38 = arith.addf %32, %37 : vector<4x64xf32>
    %c2_37 = arith.constant 2 : index
    %c0_38 = arith.constant 0 : index
    %39 = tpu.strided_load %arg11[%c2_37, %c0_38] {strides = array<i32: 2, 1>} : memref<10x128xf32, #tpu.memory_space<vmem>>, vector<4x128xf32>
    %40 = arith.truncf %39 : vector<4x128xf32> to vector<4x128xbf16>
    %c2_39 = arith.constant 2 : index
    %c0_40 = arith.constant 0 : index
    %c0_41 = arith.constant 0 : index
    %41 = vector.load %arg4[%c2_39, %c0_40, %c0_41] : memref<3x128x64xbf16, #tpu.memory_space<vmem>>, vector<1x128x64xbf16>
    %42 = vector.shape_cast %41 : vector<1x128x64xbf16> to vector<128x64xbf16>
    %cst_42 = arith.constant dense<0.000000e+00> : vector<4x64xf32>
    %43 = tpu.matmul %40, %42, %cst_42 {dimension_numbers = #tpu.dot_dimension_numbers<[1], [0], [0], [1], [0, 0, 1, 1], [], []>} : vector<4x128xbf16>, vector<128x64xbf16>, vector<4x64xf32> -> vector<4x64xf32>
    %44 = arith.addf %38, %43 : vector<4x64xf32>
    %c0_43 = arith.constant 0 : index
    %c0_44 = arith.constant 0 : index
    %45 = vector.load %arg5[%c0_43, %c0_44] : memref<1x64xf32, #tpu.memory_space<vmem>>, vector<1x64xf32>
    %46 = vector.broadcast %45 : vector<1x64xf32> to vector<4x64xf32>
    %47 = arith.addf %44, %46 : vector<4x64xf32>
    %cst_45 = arith.constant 0.000000e+00 : f32
    %48 = vector.broadcast %cst_45 : f32 to vector<4x64xf32>
    %49 = arith.maximumf %47, %48 : vector<4x64xf32>
    %cst_46 = arith.constant 0.000000e+00 : f32
    %50 = vector.broadcast %cst_46 : f32 to vector<6x64xf32>
    %c0_47 = arith.constant 0 : index
    %c0_48 = arith.constant 0 : index
    %51 = vector.load %arg12[%c0_47, %c0_48] : memref<6x64xf32, #tpu.memory_space<vmem>>, vector<6x64xf32>
    tpu.vector_store %arg12[%c0_47, %c0_48], %50 {strides = array<i32>} : memref<6x64xf32, #tpu.memory_space<vmem>>, vector<6x64xf32>,
    %c1_49 = arith.constant 1 : index
    %c0_50 = arith.constant 0 : index
    %52 = vector.load %arg12[%c1_49, %c0_50] : memref<6x64xf32, #tpu.memory_space<vmem>>, vector<4x64xf32>
    tpu.vector_store %arg12[%c1_49, %c0_50], %49 {strides = array<i32>} : memref<6x64xf32, #tpu.memory_space<vmem>>, vector<4x64xf32>,
    %c0_51 = arith.constant 0 : index
    %c0_52 = arith.constant 0 : index
    %53 = tpu.strided_load %arg12[%c0_51, %c0_52] {strides = array<i32: 2, 1>} : memref<6x64xf32, #tpu.memory_space<vmem>>, vector<2x64xf32>
    %54 = arith.truncf %53 : vector<2x64xf32> to vector<2x64xbf16>
    %c0_53 = arith.constant 0 : index
    %c0_54 = arith.constant 0 : index
    %c0_55 = arith.constant 0 : index
    %55 = vector.load %arg6[%c0_53, %c0_54, %c0_55] : memref<3x64x32xbf16, #tpu.memory_space<vmem>>, vector<1x64x32xbf16>
    %56 = vector.shape_cast %55 : vector<1x64x32xbf16> to vector<64x32xbf16>
    %cst_56 = arith.constant dense<0.000000e+00> : vector<2x32xf32>
    %57 = tpu.matmul %54, %56, %cst_56 {dimension_numbers = #tpu.dot_dimension_numbers<[1], [0], [0], [1], [0, 0, 1, 1], [], []>} : vector<2x64xbf16>, vector<64x32xbf16>, vector<2x32xf32> -> vector<2x32xf32>
    %c1_57 = arith.constant 1 : index
    %c0_58 = arith.constant 0 : index
    %58 = tpu.strided_load %arg12[%c1_57, %c0_58] {strides = array<i32: 2, 1>} : memref<6x64xf32, #tpu.memory_space<vmem>>, vector<2x64xf32>
    %59 = arith.truncf %58 : vector<2x64xf32> to vector<2x64xbf16>
    %c1_59 = arith.constant 1 : index
    %c0_60 = arith.constant 0 : index
    %c0_61 = arith.constant 0 : index
    %60 = vector.load %arg6[%c1_59, %c0_60, %c0_61] : memref<3x64x32xbf16, #tpu.memory_space<vmem>>, vector<1x64x32xbf16>
    %61 = vector.shape_cast %60 : vector<1x64x32xbf16> to vector<64x32xbf16>
    %cst_62 = arith.constant dense<0.000000e+00> : vector<2x32xf32>
    %62 = tpu.matmul %59, %61, %cst_62 {dimension_numbers = #tpu.dot_dimension_numbers<[1], [0], [0], [1], [0, 0, 1, 1], [], []>} : vector<2x64xbf16>, vector<64x32xbf16>, vector<2x32xf32> -> vector<2x32xf32>
    %63 = arith.addf %57, %62 : vector<2x32xf32>
    %c2_63 = arith.constant 2 : index
    %c0_64 = arith.constant 0 : index
    %64 = tpu.strided_load %arg12[%c2_63, %c0_64] {strides = array<i32: 2, 1>} : memref<6x64xf32, #tpu.memory_space<vmem>>, vector<2x64xf32>
    %65 = arith.truncf %64 : vector<2x64xf32> to vector<2x64xbf16>
    %c2_65 = arith.constant 2 : index
    %c0_66 = arith.constant 0 : index
    %c0_67 = arith.constant 0 : index
    %66 = vector.load %arg6[%c2_65, %c0_66, %c0_67] : memref<3x64x32xbf16, #tpu.memory_space<vmem>>, vector<1x64x32xbf16>
    %67 = vector.shape_cast %66 : vector<1x64x32xbf16> to vector<64x32xbf16>
    %cst_68 = arith.constant dense<0.000000e+00> : vector<2x32xf32>
    %68 = tpu.matmul %65, %67, %cst_68 {dimension_numbers = #tpu.dot_dimension_numbers<[1], [0], [0], [1], [0, 0, 1, 1], [], []>} : vector<2x64xbf16>, vector<64x32xbf16>, vector<2x32xf32> -> vector<2x32xf32>
    %69 = arith.addf %63, %68 : vector<2x32xf32>
    %c0_69 = arith.constant 0 : index
    %c0_70 = arith.constant 0 : index
    %70 = vector.load %arg7[%c0_69, %c0_70] : memref<1x32xf32, #tpu.memory_space<vmem>>, vector<1x32xf32>
    %71 = vector.broadcast %70 : vector<1x32xf32> to vector<2x32xf32>
    %72 = arith.addf %69, %71 : vector<2x32xf32>
    %cst_71 = arith.constant 0.000000e+00 : f32
    %73 = vector.broadcast %cst_71 : f32 to vector<2x32xf32>
    %74 = arith.maximumf %72, %73 : vector<2x32xf32>
    %cst_72 = arith.constant dense<0.000000e+00> : vector<32xf32>
    %75 = vector.multi_reduction <add>, %74, %cst_72 [0] : vector<2x32xf32> to vector<32xf32>
    %76 = vector.shape_cast %75 : vector<32xf32> to vector<1x32xf32>
    %c0_73 = arith.constant 0 : index
    %c0_74 = arith.constant 0 : index
    %77 = vector.load %arg8[%c0_73, %c0_74] : memref<32x10xf32, #tpu.memory_space<vmem>>, vector<32x10xf32>
    %cst_75 = arith.constant dense<0.000000e+00> : vector<1x10xf32>
    %78 = tpu.matmul %76, %77, %cst_75 {dimension_numbers = #tpu.dot_dimension_numbers<[1], [0], [0], [1], [0, 0, 1, 1], [], []>} : vector<1x32xf32>, vector<32x10xf32>, vector<1x10xf32> -> vector<1x10xf32>
    %c0_76 = arith.constant 0 : index
    %c0_77 = arith.constant 0 : index
    %79 = vector.load %arg9[%c0_76, %c0_77] : memref<1x10xf32, #tpu.memory_space<vmem>>, vector<1x10xf32>
    %80 = arith.addf %78, %79 : vector<1x10xf32>
    %c0_78 = arith.constant 0 : index
    %c0_79 = arith.constant 0 : index
    %c0_80 = arith.constant 0 : index
    %81 = vector.load %arg10[%c0_78, %c0_79, %c0_80] : memref<1x1x10xf32, #tpu.memory_space<vmem>>, vector<1x1x10xf32>
    %82 = vector.shape_cast %81 : vector<1x1x10xf32> to vector<1x10xf32>
    %83 = vector.shape_cast %80 : vector<1x10xf32> to vector<1x1x10xf32>
    tpu.vector_store %arg10[%c0_78, %c0_79, %c0_80], %83 {strides = array<i32>} : memref<1x1x10xf32, #tpu.memory_space<vmem>>, vector<1x1x10xf32>,
    return
  }
  func.func @transform_0(%arg0: i32) -> (i32, i32, i32) {
    %c0_i32 = arith.constant 0 : i32
    %c0_i32_0 = arith.constant 0 : i32
    %c0_i32_1 = arith.constant 0 : i32
    return %arg0, %c0_i32, %c0_i32_0 : i32, i32, i32
  }
  func.func @transform_1(%arg0: i32) -> (i32, i32, i32) {
    %c0_i32 = arith.constant 0 : i32
    %c0_i32_0 = arith.constant 0 : i32
    %c0_i32_1 = arith.constant 0 : i32
    %c0_i32_2 = arith.constant 0 : i32
    return %c0_i32, %c0_i32_0, %c0_i32_1 : i32, i32, i32
  }
  func.func @transform_2(%arg0: i32) -> (i32, i32) {
    %c0_i32 = arith.constant 0 : i32
    %c0_i32_0 = arith.constant 0 : i32
    %c0_i32_1 = arith.constant 0 : i32
    return %c0_i32, %c0_i32_0 : i32, i32
  }
  func.func @transform_3(%arg0: i32) -> (i32, i32, i32) {
    %c0_i32 = arith.constant 0 : i32
    %c0_i32_0 = arith.constant 0 : i32
    %c0_i32_1 = arith.constant 0 : i32
    %c0_i32_2 = arith.constant 0 : i32
    return %c0_i32, %c0_i32_0, %c0_i32_1 : i32, i32, i32
  }
  func.func @transform_4(%arg0: i32) -> (i32, i32) {
    %c0_i32 = arith.constant 0 : i32
    %c0_i32_0 = arith.constant 0 : i32
    %c0_i32_1 = arith.constant 0 : i32
    return %c0_i32, %c0_i32_0 : i32, i32
  }
  func.func @transform_5(%arg0: i32) -> (i32, i32, i32) {
    %c0_i32 = arith.constant 0 : i32
    %c0_i32_0 = arith.constant 0 : i32
    %c0_i32_1 = arith.constant 0 : i32
    %c0_i32_2 = arith.constant 0 : i32
    return %c0_i32, %c0_i32_0, %c0_i32_1 : i32, i32, i32
  }
  func.func @transform_6(%arg0: i32) -> (i32, i32) {
    %c0_i32 = arith.constant 0 : i32
    %c0_i32_0 = arith.constant 0 : i32
    %c0_i32_1 = arith.constant 0 : i32
    return %c0_i32, %c0_i32_0 : i32, i32
  }
  func.func @transform_7(%arg0: i32) -> (i32, i32) {
    %c0_i32 = arith.constant 0 : i32
    %c0_i32_0 = arith.constant 0 : i32
    %c0_i32_1 = arith.constant 0 : i32
    return %c0_i32, %c0_i32_0 : i32, i32
  }
  func.func @transform_8(%arg0: i32) -> (i32, i32) {
    %c0_i32 = arith.constant 0 : i32
    %c0_i32_0 = arith.constant 0 : i32
    %c0_i32_1 = arith.constant 0 : i32
    return %c0_i32, %c0_i32_0 : i32, i32
  }
  func.func @transform_9(%arg0: i32) -> (i32, i32, i32) {
    %c0_i32 = arith.constant 0 : i32
    %c0_i32_0 = arith.constant 0 : i32
    %c0_i32_1 = arith.constant 0 : i32
    return %arg0, %c0_i32, %c0_i32_0 : i32, i32, i32
  }
}

</mosaic_0001>

<bundles_post_ra>
// kernel: forward.1
= control target key start
LH: loop header
LB: loop body
LE: loop exit
PB: predicated region body
PF: predicated region fallthrough
CT: control target
= control target key end

     0   :  { %14 = vsyncpa [#allocation5], 0  ;;  %s2167_s0 = inlined_call_operand.vmem [shape: f32[2,18,16], index: 0, kind: input, shape index: {}]   ;;  %s2168_s1 = inlined_call_operand.hbm [shape: bf16[3,16,128], index: 1, kind: input, shape index: {}]   ;;  %s2169_s2 = inlined_call_operand.vmem [shape: f32[1,128], index: 2, kind: input, shape index: {}]   ;;  %s2170_s3 = inlined_call_operand.hbm [shape: bf16[3,128,64], index: 3, kind: input, shape index: {}]   ;;  %s2171_s4 = inlined_call_operand.vmem [shape: f32[1,64], index: 4, kind: input, shape index: {}]   ;;  %s2172_s5 = inlined_call_operand.vmem [shape: bf16[3,64,32], index: 5, kind: input, shape index: {}]   ;;  %s2173_s6 = inlined_call_operand.vmem [shape: f32[1,32], index: 6, kind: input, shape index: {}]   ;;  %s2174_s7 = inlined_call_operand.hbm [shape: f32[32,10], index: 7, kind: input, shape index: {}]   ;;  %s2175_s8 = inlined_call_operand.vmem [shape: f32[1,10], index: 8, kind: input, shape index: {}]   ;;  %s2176_s9 = inlined_call_operand.hbm [shape: f32[2,1,10], index: 9, kind: output, shape index: {}]  }
   0x1   :  { %15 = vsyncpa [#allocation8], 0 }
   0x2   :  { %16 = vsyncpa [#allocation6], 0 }
   0x3   :  { %18 = vsyncpa [#allocation6 + $0x1], 0  ;;  %s1905_s30 = smov 0   ;;  %s1907_s10 = smov 0  }
   0x4   :  { %s1909_s11 = smov 0   ;;  %s1911_s12 = smov 0  }
   0x5 LB: > { %s1926_s13 = sadd.s32 4294967295, %s1843_s12   ;;  %s1322_s14 = sadd.s32 4294967294, %s1843_s12   ;;  %s1843_s12 = sphi %s1911_s12, %s2192_s12   ;;  %s1839_s11 = sphi %s1909_s11, %s2191_s11   ;;  %s1835_s10 = sphi %s1907_s10, %s2190_s10   ;;  %s1831_s30 = sphi %s1905_s30, %s2189_s30  }
   0x6   : > { %s1930_s15 = sadd.s32 1, %s1843_s12   ;;  %s225_s16 = sadd.s32 1, %s1839_s11 }
   0x7   : > { %s222_s17 = ssub.s32 %s1843_s12, %s1930_s15  ;;  %p235_p0 = scmp.ne.s32.totalorder %s1839_s11, %s1835_s10 }
   0x8   : > { %p223_p1 = scmp.eq.s32.totalorder %s222_s17, 0  ;;  %p236_p2 = scmp.eq.s32.totalorder %s1926_s13, 1 }
   0x9   : > { %p241_p3 = scmp.ne.s32.totalorder %s1835_s10, %s1831_s30  ;;  %p242_p4 = scmp.eq.s32.totalorder %s1322_s14, 1 }
   0xa   : > { %s1941_s18 = scalar_select %p223_p1, %s1839_s11, %s225_s16  }
   0xb   : > { %p1943_p5 = por %p236_p2, %p235_p0  ;;  %p1947_p6 = por %p242_p4, %p241_p3 }
   0xc   : > { %p1323_p7 = scmp.ge.s32.totalorder %s1843_s12, 1  ;;  %p249_p8 = scmp.lt.s32.totalorder %s1843_s12, 3 }
   0xd   : > { %s2179_s19 = scalar_select %p1943_p5, 1, 0 }
   0xe   : > { %s2180_s20 = scalar_select %p1947_p6, 1, 0 }
   0xf   : > { %p2177_p9 = scmp.eq.s32.totalorder %s1926_s13, 0  ;;  %p1954_p10 = pnand %p1323_p7, %p249_p8 }
  0x10   : > { %s1845_s22 = smov [#allocation7]   ;;  %s1846_s25 = smov [#allocation4]  }
  0x11   : > { %p1596_p11 = pneg %p1954_p10  ;;  %s277_s23 = sshll.u32 %s1845_s22, 4  ;;  %s278_s23 = int_to_ptr.vmem [resolvable:$true] %s277_s23 }
  0x12   : > { %s261_s26 = sshll.u32 %s1846_s25, 4  ;;  %s1847_s27 = smov [#allocation9]   ;;  %s262_s26 = int_to_ptr.vmem [resolvable:$true] %s261_s26 }
  0x13   : > { %p1962_p12 = pnand %p2177_p9, %p1596_p11  ;;  %s299_s28 = sshll.u32 %s1847_s27, 4  ;;  %s300_s28 = int_to_ptr.vmem [resolvable:$true] %s299_s28 }
  0x14   : > { %s1708_s29 = scalar_lea.vmem %s278_s23, 3072  ;;  %p1716_p3 = scmp.lt.s32.totalorder %s278_s23, %s278_s23 }
  0x15   : > { %p1699_p13 = pneg %p1962_p12  ;;  %p1709_p0 = scmp.ne.s32.totalorder %s278_s23, %s1708_s29 }
  0x16   : > { %p1717_p4 = scmp.lt.s32.totalorder %s1708_s29, %s1708_s29 }
  0x17   : > { %p1711_p1 = pnand %p1709_p0, %p1699_p13 }
  0x18   : > { %p1718_p7 = por %p1717_p4, %p1716_p3 }
  0x19   : > { %p1712_p2 = pneg %p1711_p1 }
  0x1b   : > { %p1719_p8 = pnand %p1718_p7, %p1712_p2 }
  0x1d   : > { %1722 = shalt.err (!%p1719_p8)
}
  0x1e   : > { %s1848_s14 = smov 64   ;;  %s1849_s16 = smov 4  }
  0x1f   : > { %1602 = dma.hbm_to_vmem [thread:$0]  (!%p1962_p12), %s2170_s3, 3072, %s278_s23, [#allocation8], %s1848_s14, %s1848_s14, %s1849_s16  }
  0x20   : > { %s1734_s25 = scalar_lea.vmem %s262_s26, 384  ;;  %p1742_p9 = scmp.lt.s32.totalorder %s262_s26, %s262_s26 }
  0x21   : > { %p1735_p11 = scmp.ne.s32.totalorder %s262_s26, %s1734_s25  ;;  %p1743_p6 = scmp.lt.s32.totalorder %s1734_s25, %s1734_s25 }
  0x23   : > { %p1737_p0 = pnand %p1735_p11, %p1699_p13  ;;  %p1744_p3 = por %p1743_p6, %p1742_p9 }
  0x25   : > { %p1738_p1 = pneg %p1737_p0 }
  0x27   : > { %p1745_p2 = pnand %p1744_p3, %p1738_p1 }
  0x29   : > { %1748 = shalt.err (!%p1745_p2)
}
  0x2a   : > { %1599 = dma.hbm_to_vmem [thread:$0]  (!%p1962_p12), %s2168_s1, 384, %s262_s26, [#allocation5], %s1848_s14, %s1848_s14, %s1849_s16  }
  0x2b   : > { %s1760_s23 = scalar_lea.vmem %s300_s28, 512  ;;  %p1768_p11 = scmp.lt.s32.totalorder %s300_s28, %s300_s28 }
  0x2c   : > { %p1761_p4 = scmp.ne.s32.totalorder %s300_s28, %s1760_s23  ;;  %p1769_p0 = scmp.lt.s32.totalorder %s1760_s23, %s1760_s23 }
  0x2e   : > { %p1763_p7 = pnand %p1761_p4, %p1699_p13  ;;  %p1770_p5 = por %p1769_p0, %p1768_p11 }
  0x30   : > { %p1764_p8 = pneg %p1763_p7 }
  0x32   : > { %p1771_p6 = pnand %p1770_p5, %p1764_p8 }
  0x34   : > { %1774 = shalt.err (!%p1771_p6)
}
  0x35   : > { %s1850_s17 = smov 128   ;;  %s1851_s22 = smov 8  }
  0x36   : > { %1605 = dma.hbm_to_vmem [thread:$0]  (!%p1962_p12), %s2174_s7, 512, %s300_s28, [#allocation8], %s1850_s17, %s1850_s17, %s1851_s22  }
  0x37   : > { %326 = sbr.rel (%p1954_p10) target bundleno = 970 (0x3ca), region = 56  ;;  %p2183_p9 = scmp.eq.s32.totalorder (!%p1954_p10), %s1926_s13, 0 }
  0x3c   : > { %1818 = dma.done.wait (%p2183_p9), [#allocation5], 384   ;;  %p2184_p13 = pmov %p2183_p9 }
  0x3d   : > { %p2185_p5 = pmov %p2183_p9 }
  0x3e   : > { %1820 = vsyncadd (%p2184_p13), [#allocation5], 4294966912 }
  0x3f   : > { %1822 = dma.done.wait (%p2185_p5), [#allocation8], 3584   ;;  %p2186_p1 = pmov %p2185_p5 }
  0x40   : > { %p369_p3 = scmp.lt.s32.totalorder %s1926_s13, 1  ;;  %v1852_v0 = vmov 0.0   ;;  %vm1853_vm0 = vmmov 0   ;;  %v1658_v1 = vld [vmem:[#allocation4 + $0x8] sm:$0xff]   ;;  %v1659_v2 = vld [vmem:[#allocation4] sm:$0xff]   ;;  %vm391_vm1 = vcmask 130048  }
  0x41   : > { %1824 = vsyncadd (%p2186_p1), [#allocation8], 4294963712  ;;  %1456 = vmatprep.subr.bf16.mxu0 %v1852_v0  ;;  %549 = vst [vmem:[#allocation2] sm:$0xff] %v1852_v0  ;;  %1462 = vmatprep.subr.bf16.mxu1 %v1852_v0  ;;  %v1660_v7 = vld [vmem:[#allocation4 + $0x10] sm:$0xff]   ;;  %v1663_v10 = vld [vmem:[#allocation7 + $0x70] sm:$0xff]   ;;  %vm884_vm2 = vcmask 521216  }
  0x42   : > { %550 = vst [vmem:[#allocation2 + $0x8] sm:$0x3] %v1852_v0  ;;  %1458 = vmatprep.mubr.msk.bf16.mxu0 %vm1853_vm0, %v1852_v0  ;;  %s370_s21 = scalar_select %p369_p3, %s1926_s13, 1  ;;  %1464 = vmatprep.mubr.msk.bf16.mxu1 %vm1853_vm0, %v1852_v0  ;;  %v1661_v8 = vld [vmem:[#allocation7 + $0x78] sm:$0xff]   ;;  %v1664_v13 = vld [vmem:[#allocation7 + $0x30] sm:$0xff]   ;;  %v1665_v14 = vld [vmem:[#allocation7 + $0x68] sm:$0xff]  }
  0x43   : > { %1457 = vmatpush3.bf16.msra.mxu0 %v1658_v1  ;;  %1463 = vmatpush3.bf16.msra.mxu1 %v1659_v2  ;;  %v1662_v11 = vld [vmem:[#allocation7 + $0x38] sm:$0xff]   ;;  %v1666_v15 = vld [vmem:[#allocation7 + $0x28] sm:$0xff]   ;;  %v1667_v16 = vld [vmem:[#allocation7 + $0x60] sm:$0xff]   ;;  %885 = vst.msk [vmem:[#allocation3] sm:$0x3f] %vm884_vm2, %v1852_v0  ;;  %vm886_vm3 = vcmask 519168  }
  0x44   : > { %s1581_s24 = smul.u32 24, %s370_s21  ;;  %1468 = vmatprep.subr.bf16.mxu0 %v1852_v0  ;;  %1474 = vmatprep.subr.bf16.mxu1 %v1852_v0  ;;  %v1668_v17 = vld [vmem:[#allocation7 + $0x20] sm:$0xff]   ;;  %v1669_v18 = vld [vmem:[#allocation7 + $0x58] sm:$0xff]   ;;  %v1671_v20 = vld [vmem:[#allocation7 + $0x50] sm:$0xff]   ;;  %vm934_vm4 = vcmask 523264   ;;  %vm1134_vm5 = vcmask 254976  }
  0x45   : > { %v1670_v19 = vld [vmem:[#allocation7 + $0x18] sm:$0xff]   ;;  %v1672_v21 = vld [vmem:[#allocation7 + $0x10] sm:$0xff]   ;;  %v1673_v22 = vld [vmem:[#allocation7 + $0x48] sm:$0xff]   ;;  %vm1147_vm6 = vcmask 261120   ;;  %s367_s27 = sand.u32 1, %s1835_s10   ;;  %s1400_s26 = sshll.u32 %s1926_s13, 4 }
  0x46   : > { %s373_s14 = scalar_lea.vmem %s2167_s0, %s1581_s24  ;;  %v1674_v23 = vld [vmem:[#allocation7 + $0x8] sm:$0xff]   ;;  %v1675_v24 = vld [vmem:[#allocation7 + $0x40] sm:$0xff]   ;;  %v1341_v36 = vld [vmem:[%s2169_s2] ss:$0 sm:$0xff]  ;;  %s368_s28 = scalar_lea.vmem [#allocation10], %s367_s27  ;;  %vm1221_vm7 = vcmask 73728  }
  0x47   : > { %v1333_v3 = vld [vmem:[%s373_s14 + $0x1] ss:$2 sm:$0xff]  ;;  %v375_v4 = vld [vmem:[%s373_s14] ss:$2 sm:$0xff]  ;;  %v1676_v25 = vld [vmem:[#allocation7] sm:$0xff]   ;;  %s2132_s23 = scalar_lea.hbm %s2176_s9, %s1400_s26  ;;  %s1224_s17 = scalar_lea.sflag [#allocation6], %s367_s27 }
  0x48   : > { %v381_v5 = vpack.c.bf16 %v1333_v3, %v1333_v3  ;;  %v376_v6 = vpack.c.bf16 %v375_v4, %v375_v4  ;;  %v1338_v9 = vld [vmem:[%s373_s14 + $0x2] ss:$2 sm:$0xff]  ;;  %v1679_v49 = vld [vmem:[#allocation7 + $0xa8] sm:$0xff]   ;;  %s1236_s14 = sshll.u32 %s368_s28, 4  ;;  %p2187_p12 = scmp.ne.s32.totalorder %s2179_s19, 0  ;;  %s1237_s14 = int_to_ptr.vmem [resolvable:$true] %s1236_s14 }
  0x49   : > { %v486_v12 = vpack.c.bf16 %v1338_v9, %v1338_v9  ;;  %v1677_v43 = vld [vmem:[#allocation7 + $0xb8] sm:$0xff]   ;;  %v1678_v48 = vld [vmem:[#allocation7 + $0xb0] sm:$0xff]   ;;  %v1680_v50 = vld [vmem:[#allocation7 + $0xa0] sm:$0xff]   ;;  %s1775_s22 = scalar_lea.vmem %s1237_s14, 16  ;;  %s1854_s13 = smov [#allocation10]  }
  0x4a   : > { %1459 = vmatmul.mubr.msk.bf16.vlgmr.msra.gmra.mxu0 %vm391_vm1, %v381_v5  ;;  %1465 = vmatmul.mubr.msk.bf16.vlgmr.msra.gmra.mxu1 %vm391_vm1, %v376_v6  ;;  %v1681_v51 = vld [vmem:[#allocation7 + $0x98] sm:$0xff]   ;;  %v1682_v52 = vld [vmem:[#allocation7 + $0x90] sm:$0xff]   ;;  %v1683_v53 = vld [vmem:[#allocation7 + $0x88] sm:$0xff]   ;;  %p1776_p10 = scmp.ne.s32.totalorder %s1237_s14, %s1775_s22  ;;  %s1779_s25 = sshll.u32 %s1854_s13, 4  ;;  %s1780_s25 = int_to_ptr.vmem [resolvable:$false] %s1779_s25 }
  0x4b   : > { %1469 = vmatpush3.bf16.msra.mxu0 %v1660_v7  ;;  %1470 = vmatprep.mubr.msk.bf16.mxu0 %vm1853_vm0, %v1852_v0  ;;  %v1684_v54 = vld [vmem:[#allocation7 + $0x80] sm:$0xff]   ;;  %v1685_v57 = vld [vmem:[%s2172_s5 + $0x38] sm:$0xff]   ;;  %v1689_v61 = vld [vmem:[%s2172_s5 + $0x28] sm:$0xff]   ;;  %s1781_s21 = scalar_lea.vmem %s1780_s25, 32  ;;  %p1782_p7 = scmp.lt.s32.totalorder %s1237_s14, %s1780_s25 }
  0x4c   : > { %1475 = vmatpush3.bf16.msra.mxu1 %v1661_v8  ;;  %1494 = vmatprep.subr.bf16.mxu0 %v1852_v0  ;;  %v1686_v58 = vld [vmem:[%s2172_s5 + $0x58] sm:$0xff]   ;;  %v1687_v59 = vld [vmem:[%s2172_s5 + $0x30] sm:$0xff]   ;;  %v1690_v62 = vld [vmem:[%s2172_s5 + $0x48] sm:$0xff]   ;;  %p1777_p2 = pnand %p1776_p10, %p2187_p12  ;;  %p1783_p8 = scmp.lt.s32.totalorder %s1781_s21, %s1775_s22 }
  0x4d   : > { %1476 = vmatprep.subr.bf16.mxu1 %v1852_v0  ;;  %1490 = vmatprep.mubr.msk.bf16.mxu1 %vm1853_vm0, %v1852_v0  ;;  %v1688_v60 = vld [vmem:[%s2172_s5 + $0x50] sm:$0xff]   ;;  %v1691_v63 = vld [vmem:[%s2172_s5 + $0x20] sm:$0xff]  }
  0x4e   : > { %v1692_v1 = vld [vmem:[%s2172_s5 + $0x40] sm:$0xff]   ;;  %p1778_p4 = pneg %p1777_p2  ;;  %p1784_p11 = por %p1783_p8, %p1782_p7 }
  0x50   : > { %1477 = vmatpush3.bf16.msra.mxu1 %v1663_v10  ;;  %p1785_p0 = pnand %p1784_p11, %p1778_p4 }
  0x51   : > { %1478 = vmatprep.subr.bf16.mxu1 %v1852_v0 }
  0x52   : > { %1471 = vmatmul.mubr.msk.bf16.vlgmr.msra.gmra.mxu0 %vm391_vm1, %v486_v12  ;;  %v1366_v12 = vld [vmem:[%s2171_s4] ss:$0 sm:$0xff] }
  0x53   : > { %1495 = vmatpush3.bf16.msra.mxu0 %v1662_v11  ;;  %1510 = vmatprep.mubr.msk.bf16.mxu0 %vm1853_vm0, %v1852_v0 }
  0x54   : > { %1496 = vmatprep.subr.bf16.mxu0 %v1852_v0  ;;  %1479 = vmatpush3.bf16.msra.mxu1 %v1665_v14 }
  0x55   : > { %1480 = vmatprep.subr.bf16.mxu1 %v1852_v0 }
  0x57   : > { %1497 = vmatpush3.bf16.msra.mxu0 %v1664_v13 }
  0x58   : > { %1498 = vmatprep.subr.bf16.mxu0 %v1852_v0  ;;  %1481 = vmatpush3.bf16.msra.mxu1 %v1667_v16 }
  0x59   : > { %1482 = vmatprep.subr.bf16.mxu1 %v1852_v0 }
  0x5b   : > { %1499 = vmatpush3.bf16.msra.mxu0 %v1666_v15 }
  0x5c   : > { %1500 = vmatprep.subr.bf16.mxu0 %v1852_v0  ;;  %1483 = vmatpush3.bf16.msra.mxu1 %v1669_v18 }
  0x5d   : > { %1484 = vmatprep.subr.bf16.mxu1 %v1852_v0 }
  0x5f   : > { %1501 = vmatpush3.bf16.msra.mxu0 %v1668_v17 }
  0x60   : > { %1502 = vmatprep.subr.bf16.mxu0 %v1852_v0  ;;  %1485 = vmatpush3.bf16.msra.mxu1 %v1671_v20 }
  0x61   : > { %1486 = vmatprep.subr.bf16.mxu1 %v1852_v0 }
  0x63   : > { %1503 = vmatpush3.bf16.msra.mxu0 %v1670_v19  ;;  %v1693_v19 = vld [vmem:[%s2172_s5 + $0x18] sm:$0xff]  }
  0x64   : > { %1504 = vmatprep.subr.bf16.mxu0 %v1852_v0  ;;  %1487 = vmatpush3.bf16.msra.mxu1 %v1673_v22 }
  0x65   : > { %1488 = vmatprep.subr.bf16.mxu1 %v1852_v0 }
  0x67   : > { %1505 = vmatpush3.bf16.msra.mxu0 %v1672_v21 }
  0x68   : > { %1506 = vmatprep.subr.bf16.mxu0 %v1852_v0  ;;  %1489 = vmatpush3.bf16.msra.mxu1 %v1675_v24  ;;  %v1694_v24 = vld [vmem:[%s2172_s5 + $0x10] sm:$0xff]  }
  0x69   : > { %1514 = vmatprep.subr.bf16.mxu1 %v1852_v0 }
  0x6b   : > { %1507 = vmatpush3.bf16.msra.mxu0 %v1674_v23 }
  0x6c   : > { %1508 = vmatprep.subr.bf16.mxu0 %v1852_v0 }
  0x6f   : > { %1509 = vmatpush3.bf16.msra.mxu0 %v1676_v25  ;;  %v1695_v25 = vld [vmem:[%s2172_s5 + $0x8] sm:$0xff]  }
  0x70   : > { %1534 = vmatprep.subr.bf16.mxu0 %v1852_v0 }
 0x10a   : > { %v429_v26 = vpop.f32.mrf.mxu0  ;;  %v478_v27 = vpop.f32.mrf.mxu1 }
 0x10b   : > { %v479_v33 = vadd.f32 %v478_v27, %v429_v26  ;;  %v1696_v26 = vld [vmem:[%s2172_s5] sm:$0xff]  }
 0x10c   : > { %v1460_v28 = vpop.f32.mrf.mxu0  ;;  %v1466_v29 = vpop.f32.mrf.mxu1 }
 0x10d   : > { %v1145_v29 = vld [vmem:[#allocation9 + $0x18] sm:$0xff] }
 0x10e   : > { %v432_v30 = vpop.f32.mrf.mxu0  ;;  %v481_v31 = vpop.f32.mrf.mxu1 }
 0x10f   : > { %v1144_v30 = vld [vmem:[#allocation9 + $0x10] sm:$0xff]  ;;  %v1143_v31 = vld [vmem:[#allocation9 + $0x8] sm:$0xff] }
 0x110   : > { %v1461_v32 = vpop.f32.mrf.mxu0  ;;  %v1467_v34 = vpop.f32.mrf.mxu1 }
 0x111   : > { %v1142_v32 = vld [vmem:[#allocation9] sm:$0xff] }
 0x112   : > { %v533_v35 = vpop.f32.mrf.mxu0 }
 0x113   : > { %v539_v37 = vadd.f32 %v533_v35, %v479_v33 }
 0x114   : > { %v1472_v38 = vpop.f32.mrf.mxu0 }
 0x115   : > { %v547_v39 = vadd.f32 %v1341_v36, %v539_v37 }
 0x116   : > { %v536_v40 = vpop.f32.mrf.mxu0 }
 0x117   : > { %v548_v41 = vmax.f32 %v547_v39, 0.0 }
 0x118   : > { %v1473_v42 = vpop.f32.mrf.mxu0 }
 0x119   : > { %551 = vst [vmem:[#allocation2 + $0x1] sm:$0xff] %v548_v41 }
 0x120   : > { %v571_v44 = vld [vmem:[#allocation2 + $0x1] ss:$2 sm:$0xf]  ;;  %v552_v45 = vld [vmem:[#allocation2] ss:$2 sm:$0xf] }
 0x121   : > { %v572_v46 = vpack.c.bf16 %v571_v44, %v571_v44  ;;  %v553_v47 = vpack.c.bf16 %v552_v45, %v552_v45  ;;  %v767_v55 = vld [vmem:[#allocation2 + $0x2] ss:$2 sm:$0xf] }
 0x122   : > { %v768_v56 = vpack.c.bf16 %v767_v55, %v767_v55 }
 0x123   : > { %1491 = vmatmul.mubr.bf16.vlgmr.msra.gmra.mxu1 %v572_v46  ;;  %1511 = vmatmul.mubr.bf16.vlgmr.msra.gmra.mxu0 %v553_v47 }
 0x124   : > { %1515 = vmatpush3.bf16.msra.mxu1 %v1677_v43  ;;  %1530 = vmatprep.mubr.msk.bf16.mxu1 %vm1853_vm0, %v1852_v0  ;;  %v1398_v43 = vld [vmem:[%s2173_s6] ss:$0 sm:$0xff] }
 0x125   : > { %1516 = vmatprep.subr.bf16.mxu1 %v1852_v0  ;;  %1542 = vmatprep.mubr.msk.bf16.mxu0 %vm1853_vm0, %v1852_v0 }
 0x126   : > { %1535 = vmatpush3.bf16.msra.mxu0 %v1685_v57 }
 0x127   : > { %1536 = vmatprep.subr.bf16.mxu0 %v1852_v0 }
 0x128   : > { %1517 = vmatpush3.bf16.msra.mxu1 %v1678_v48 }
 0x129   : > { %1518 = vmatprep.subr.bf16.mxu1 %v1852_v0 }
 0x12a   : > { %1537 = vmatpush3.bf16.msra.mxu0 %v1687_v59 }
 0x12b   : > { %1538 = vmatprep.subr.bf16.mxu0 %v1852_v0 }
 0x12c   : > { %1519 = vmatpush3.bf16.msra.mxu1 %v1679_v49 }
 0x12d   : > { %1520 = vmatprep.subr.bf16.mxu1 %v1852_v0 }
 0x12e   : > { %1539 = vmatpush3.bf16.msra.mxu0 %v1689_v61 }
 0x12f   : > { %1540 = vmatprep.subr.bf16.mxu0 %v1852_v0 }
 0x130   : > { %1521 = vmatpush3.bf16.msra.mxu1 %v1680_v50 }
 0x131   : > { %1522 = vmatprep.subr.bf16.mxu1 %v1852_v0 }
 0x132   : > { %1541 = vmatpush3.bf16.msra.mxu0 %v1691_v63 }
 0x133   : > { %1546 = vmatprep.subr.bf16.mxu0 %v1852_v0 }
 0x134   : > { %1523 = vmatpush3.bf16.msra.mxu1 %v1681_v51 }
 0x135   : > { %1524 = vmatprep.subr.bf16.mxu1 %v1852_v0 }
 0x138   : > { %1525 = vmatpush3.bf16.msra.mxu1 %v1682_v52 }
 0x139   : > { %1526 = vmatprep.subr.bf16.mxu1 %v1852_v0 }
 0x13c   : > { %1527 = vmatpush3.bf16.msra.mxu1 %v1683_v53 }
 0x13d   : > { %1528 = vmatprep.subr.bf16.mxu1 %v1852_v0 }
 0x140   : > { %1529 = vmatpush3.bf16.msra.mxu1 %v1684_v54 }
 0x141   : > { %1558 = vmatprep.subr.bf16.mxu1 %v1852_v0 }
 0x143   : > { %1531 = vmatmul.mubr.bf16.vlgmr.msra.gmra.mxu1 %v768_v56  ;;  %v1146_v56 = vld [vmem:[%s2175_s8] sm:$0x1] }
 0x144   : > { %1566 = vmatprep.mubr.msk.bf16.mxu1 %vm1853_vm0, %v1852_v0  ;;  %1559 = vmatpush3.bf16.msra.mxu1 %v1686_v58 }
 0x145   : > { %1560 = vmatprep.subr.bf16.mxu1 %v1852_v0 }
 0x148   : > { %1561 = vmatpush3.bf16.msra.mxu1 %v1688_v60 }
 0x149   : > { %1562 = vmatprep.subr.bf16.mxu1 %v1852_v0 }
 0x14c   : > { %1563 = vmatpush3.bf16.msra.mxu1 %v1690_v62 }
 0x14d   : > { %1564 = vmatprep.subr.bf16.mxu1 %v1852_v0 }
 0x150   : > { %1565 = vmatpush3.bf16.msra.mxu1 %v1692_v1 }
 0x1e3   : > { %v672_v2 = vpop.f32.mrf.mxu1  ;;  %v760_v3 = vpop.f32.mrf.mxu0 }
 0x1e4   : > { %v761_v10 = vadd.f32 %v760_v3, %v672_v2 }
 0x1e5   : > { %v1492_v4 = vpop.f32.mrf.mxu1  ;;  %v1512_v5 = vpop.f32.mrf.mxu0 }
 0x1e7   : > { %v675_v6 = vpop.f32.mrf.mxu1  ;;  %v763_v7 = vpop.f32.mrf.mxu0 }
 0x1e9   : > { %v1493_v8 = vpop.f32.mrf.mxu1  ;;  %v1513_v9 = vpop.f32.mrf.mxu0 }
 0x203   : > { %v868_v11 = vpop.f32.mrf.mxu1 }
 0x204   : > { %v874_v13 = vadd.f32 %v868_v11, %v761_v10 }
 0x205   : > { %v1532_v14 = vpop.f32.mrf.mxu1 }
 0x206   : > { %v882_v15 = vadd.f32 %v1366_v12, %v874_v13 }
 0x207   : > { %v871_v16 = vpop.f32.mrf.mxu1 }
 0x208   : > { %v883_v17 = vmax.f32 %v882_v15, 0.0 }
 0x209   : > { %v1533_v18 = vpop.f32.mrf.mxu1 }
 0x20a   : > { %887 = vst.msk [vmem:[#allocation3 + $0x1] sm:$0xf] %vm886_vm3, %v883_v17 }
 0x211   : > { %v899_v20 = vld [vmem:[#allocation3 + $0x1] ss:$2 sm:$0x3]  ;;  %v1046_v21 = vld [vmem:[#allocation3 + $0x2] ss:$2 sm:$0x3] }
 0x212   : > { %v900_v22 = vpack.c.bf16 %v899_v20, %v899_v20  ;;  %v1047_v23 = vpack.c.bf16 %v1046_v21, %v1046_v21  ;;  %v888_v27 = vld [vmem:[#allocation3] ss:$2 sm:$0x3] }
 0x213   : > { %v889_v28 = vpack.c.bf16 %v888_v27, %v888_v27 }
 0x214   : > { %1543 = vmatmul.mubr.msk.bf16.vlgmr.msra.gmra.mxu0 %vm934_vm4, %v900_v22  ;;  %1567 = vmatmul.mubr.msk.bf16.vlgmr.msra.gmra.mxu1 %vm934_vm4, %v1047_v23 }
 0x215   : > { %1547 = vmatpush3.bf16.msra.mxu0 %v1693_v19  ;;  %1554 = vmatprep.mubr.msk.bf16.mxu0 %vm1853_vm0, %v1852_v0 }
 0x216   : > { %1548 = vmatprep.subr.bf16.mxu0 %v1852_v0 }
 0x219   : > { %1549 = vmatpush3.bf16.msra.mxu0 %v1694_v24 }
 0x21a   : > { %1550 = vmatprep.subr.bf16.mxu0 %v1852_v0 }
 0x21d   : > { %1551 = vmatpush3.bf16.msra.mxu0 %v1695_v25 }
 0x21e   : > { %1552 = vmatprep.subr.bf16.mxu0 %v1852_v0 }
 0x221   : > { %1553 = vmatpush3.bf16.msra.mxu0 %v1696_v26 }
 0x222   : > { %1570 = vmatprep.subr.mxu0 %v1852_v0 }
 0x224   : > { %1555 = vmatmul.mubr.msk.bf16.vlgmr.msra.gmra.mxu0 %vm934_vm4, %v889_v28 }
 0x225   : > { %1578 = vmatprep.mubr.msk.f32.mxu0 %vm1853_vm0, %v1852_v0  ;;  %1571 = vmatpush3.msra.mxu0 %v1145_v29 }
 0x226   : > { %1572 = vmatprep.subr.mxu0 %v1852_v0 }
 0x227   : > { %1573 = vmatpush3.msra.mxu0 %v1144_v30 }
 0x228   : > { %1574 = vmatprep.subr.mxu0 %v1852_v0 }
 0x229   : > { %1575 = vmatpush3.msra.mxu0 %v1143_v31 }
 0x22a   : > { %1576 = vmatprep.subr.mxu0 %v1852_v0 }
 0x22b   : > { %1577 = vmatpush3.msra.mxu0 %v1142_v32 }
 0x2d4   : > { %v972_v33 = vpop.f32.mrf.mxu0  ;;  %v1118_v34 = vpop.f32.mrf.mxu1 }
 0x2d6   : > { %v1544_v35 = vpop.f32.mrf.mxu0  ;;  %v1568_v36 = vpop.f32.mrf.mxu1 }
 0x2d8   : > { %v975_v37 = vpop.f32.mrf.mxu0  ;;  %v1121_v38 = vpop.f32.mrf.mxu1 }
 0x2da   : > { %v1545_v39 = vpop.f32.mrf.mxu0  ;;  %v1569_v40 = vpop.f32.mrf.mxu1 }
 0x2e4   : > { %v1039_v41 = vpop.f32.mrf.mxu0 }
 0x2e5   : > { %v1040_v42 = vadd.f32 %v1039_v41, %v972_v33 }
 0x2e6   : > { %v1556_v44 = vpop.f32.mrf.mxu0 }
 0x2e7   : > { %v1124_v45 = vadd.f32 %v1118_v34, %v1040_v42 }
 0x2e8   : > { %v1042_v46 = vpop.f32.mrf.mxu0 }
 0x2e9   : > { %v1132_v0 = vadd.f32 %v1398_v43, %v1124_v45 }
 0x2ea   : > { %v1557_v47 = vpop.f32.mrf.mxu0 }
 0x2eb   : > { %v1133_v48 = vmax.f32 %v1132_v0, 0.0 }
 0x2ed   : > { %v1135_v49 = vsel %vm1134_vm5, %v1133_v48, 0.0 }
 0x2ee   : > { %v1136_v50 = vrot.slane %v1135_v49, 4 }
 0x2f0   : > { %v1137_v51 = vadd.f32 %v1136_v50, %v1135_v49 }
 0x2f2   : > { %v1138_v52 = vrot.slane %v1137_v51, 2 }
 0x2f4   : > { %v1139_v53 = vadd.f32 %v1138_v52, %v1137_v51 }
 0x2f6   : > { %v1140_v54 = vrot.slane %v1139_v53, 1 }
 0x2f8   : > { %v1141_v55 = vadd.f32 %v1140_v54, %v1139_v53 }
 0x2fa   : > { %1579 = vmatmul.mubr.msk.f32.vlgmr.msra.gmra.mxu0 %vm1147_vm6, %v1141_v55 }
 0x3ba   : > { %v1217_v57 = vpop.f32.mrf.mxu0 }
 0x3bb   : > { %v1218_v58 = vadd.f32 %v1217_v57, %v1146_v56 }
 0x3bc   : > { %v1580_v59 = vpop.f32.mrf.mxu0 }
 0x3bd   : > { %1222 = vst.msk [vmem:[%s368_s28] sm:$0x1] %vm1221_vm7, %v1218_v58 }
 0x3be   : > { %1788 = shalt.err (!%p1785_p0)
}
 0x3bf   : > { %s1789_s24 = scalar_lea.hbm %s2132_s23, 16  ;;  %s1793_s28 = scalar_lea.hbm %s2176_s9, 32 }
 0x3c0   : > { %p1790_p6 = scmp.ne.s32.totalorder %s2132_s23, %s1789_s24  ;;  %p1794_p5 = scmp.lt.s32.totalorder %s2132_s23, %s2176_s9 }
 0x3c1   : > { %p1795_p1 = scmp.lt.s32.totalorder %s1793_s28, %s1789_s24 }
 0x3c2   : > { %p1791_p9 = pnand %p1790_p6, %p2187_p12 }
 0x3c3   : > { %p1796_p3 = por %p1795_p1, %p1794_p5 }
 0x3c4   : > { %p1792_p13 = pneg %p1791_p9 }
 0x3c6   : > { %p1797_p10 = pnand %p1796_p3, %p1792_p13 }
 0x3c8   : > { %1800 = shalt.err (!%p1797_p10)
}
 0x3c9   : > { %1594 = dma.vmem_to_hbm [thread:$0]  (%p2187_p12), %s1237_s14, 16, %s2132_s23, %s1224_s17  }
 0x3ca PF: > { %p1616_p2 = scmp.ge.s32.totalorder %s1843_s12, 2  ;;  %s1248_s22 = sand.u32 1, %s1831_s30  }
 0x3cb   : > { %p2188_p4 = scmp.ne.s32.totalorder %s2180_s20, 0  ;;  %s1249_s13 = scalar_lea.sflag [#allocation6], %s1248_s22 }
 0x3cd   : > { %p1607_p7 = pnand %p1616_p2, %p2188_p4 }
 0x3cf   : > { %p1608_p8 = pneg %p1607_p7 }
 0x3d1   : > { %1826 = dma.done.wait (%p1608_p8), %s1249_s13, 16  }
 0x3d2   : > { %1828 = vsyncadd (%p1608_p8), %s1249_s13, 4294967280  ;;  %p21_p11 = scmp.ge.s32.totalorder %s1930_s15, 4   ;;  %s2189_s30 = smov %s1835_s10 }
 0x3d3   : > { %s2190_s10 = smov %s1839_s11  ;;  %s2191_s11 = smov %s1941_s18 }
 0x3d4   : > { %s2192_s12 = smov %s1930_s15  ;;  %23 = sbr.rel (!%p21_p11) target bundleno = 5 (0x5), region = 116 }
 0x3d9   :  { %1253 = vsyncpa [#allocation5], 1 }
 0x3da   :  { %1255 = vsyncpa [#allocation5 + $0x1], 1 }
 0x3db   :  { %1256 = vsyncpa [#allocation8], 1 }
 0x3dc   :  { %1257 = vsyncpa [#allocation6], 1 }
 0x3dd   :  { %1259 = vsyncpa [#allocation6 + $0x1], 1 }

</bundles_post_ra>
